<compile_context>
chip_gen: v7x
topology: tpu7x:2x2x1
jax: 0.10.0
libtpu: 0.0.40
codegen_flags: <defaults>
</compile_context>

<pallas_src>
import math

import jax
import jax.numpy as jnp
from jax.experimental import pallas as pl
from jax.experimental.pallas import tpu as pltpu


# ----------------------------------------------------------------------------
# Kernel (statically specialized on residual mode / batch tile / spatial size)
# ----------------------------------------------------------------------------
def _make_ca_res_kernel(res_mode, Bt, H, W):
    """res_mode: 'identity' | 'conv' | 'none' (static Python specialization)."""
    Hp = H + 2               # rows per sample inside the row-padded scratch
    Mv = Bt * Hp - 2         # rows covered by the shifted banded dots
    inv_hw = 1.0 / float(H * W)

    def kernel(*refs):
        if res_mode == "conv":
            (x_ref, w1_ref, b1_ref, w2_ref, b2_ref, big_ref,
             wd_ref, bd_ref, out_ref, xpad, ypad) = refs
        else:
            (x_ref, w1_ref, b1_ref, w2_ref, b2_ref, big_ref,
             out_ref, xpad, ypad) = refs

        WCin = x_ref.shape[2]         # W * Cin on the lane axis
        WCo = w1_ref.shape[2]         # W * Cout on the lane axis
        cdt = w1_ref.dtype            # matmul operand dtype (bf16 by default)
        f32 = jnp.float32

        # ---- row-padded relu(x): per-sample zero halo rows + dense interior ----
        # (halos re-zeroed every step -> no cross-step state; safe under
        # "parallel" grid semantics / megacore sharding)
        zin = jnp.zeros((1, WCin), f32)
        for s in range(Bt):
            base = s * Hp
            xpad[base:base + 1, :] = zin
            xpad[base + 1:base + 1 + H, :] = jnp.maximum(x_ref[s], 0.0)
            xpad[base + H + 1:base + H + 2, :] = zin

        # ---- conv1(relu(x)): 3 banded matmuls, M = Bt*(H+2)-2 -------------------
        acc1 = jnp.zeros((Mv, WCo), f32)
        for dh in range(3):
            acc1 = acc1 + jnp.dot(xpad[dh:dh + Mv, :].astype(cdt), w1_ref[dh],
                                  preferred_element_type=f32)

        # ---- relu(conv1 + b1) back into the second row-padded scratch -----------
        b1 = b1_ref[...]
        zo = jnp.zeros((1, WCo), f32)
        for s in range(Bt):
            base = s * Hp
            ypad[base:base + 1, :] = zo
            ypad[base + 1:base + 1 + H, :] = jnp.maximum(
                acc1[base:base + H, :] + b1, 0.0)
            ypad[base + H + 1:base + H + 2, :] = zo

        # ---- conv2 ----------------------------------------------------------------
        acc2 = jnp.zeros((Mv, WCo), f32)
        for dh in range(3):
            acc2 = acc2 + jnp.dot(ypad[dh:dh + Mv, :].astype(cdt), w2_ref[dh],
                                  preferred_element_type=f32)

        b2 = b2_ref[...]
        y2 = [acc2[s * Hp:s * Hp + H, :] + b2 for s in range(Bt)]   # (H, WCo) each

        # ---- ECA channel attention, batched across the batch tile ------------------
        # big = kron(ones(W,W), toeplitz(eca_w)); the global-average-pool scale
        # 1/(H*W) is applied to the per-sample column sums before the dot.
        colsum = jnp.concatenate(
            [jnp.sum(y, axis=0, keepdims=True) for y in y2], axis=0)   # (Bt, WCo)
        att = jax.nn.sigmoid(
            jnp.dot((colsum * inv_hw).astype(cdt), big_ref[...],
                    preferred_element_type=f32))                        # (Bt, WCo)

        # ---- residual (statically specialized) + dense 128-lane output stores -------
        if res_mode == "conv":
            x2d = x_ref[...].reshape(Bt * H, WCin).astype(cdt)
            ds2d = jnp.dot(x2d, wd_ref[...],
                           preferred_element_type=f32) + bd_ref[...]    # (Bt*H, WCo)

        for s in range(Bt):
            scaled = y2[s] * att[s:s + 1, :]
            if res_mode == "identity":
                out = scaled + x_ref[s]
            elif res_mode == "conv":
                out = scaled + ds2d[s * H:(s + 1) * H, :]
            else:
                out = scaled
            out_ref[s] = out.astype(out_ref.dtype)

    return kernel


# ----------------------------------------------------------------------------
# One-time weight preprocessing (banding / kron / tiling) — cache per param set
# ----------------------------------------------------------------------------
def _banded_conv_mats(w_hwio, W):
    """HWIO (3,3,Ci,Co) -> (3, W*Ci, W*Co) block-banded matrices.

    mats[dh][wu*Ci+ci, w*Co+co] = w_hwio[dh, wu-w+1, ci, co] (0 if tap invalid),
    so that  sum_dh padded(x)[row+dh] @ mats[dh]  ==  SAME-padded 3x3 conv,
    with width zero-padding absorbed into the band.
    """
    kh, kw, Ci, Co = w_hwio.shape
    pad = (kw - 1) // 2
    wu = jnp.arange(W)[:, None]             # input column
    wo = jnp.arange(W)[None, :]             # output column
    dw = wu - wo + pad                      # tap index
    valid = ((dw >= 0) & (dw < kw))[..., None, None]
    dwc = jnp.clip(dw, 0, kw - 1)
    mats = []
    for dh in range(kh):
        blocks = w_hwio[dh][dwc] * valid                    # (W, W, Ci, Co)
        mats.append(jnp.transpose(blocks, (0, 2, 1, 3)).reshape(W * Ci, W * Co))
    return jnp.stack(mats, axis=0)


def _eca_band_matrix(eca_w, c):
    """Toeplitz M with pooled @ M == Conv1d(1,1,k,pad=(k-1)//2,bias=False)(pooled)."""
    k = eca_w.shape[0]
    pad = (k - 1) // 2
    i = jnp.arange(c)[:, None]
    j = i - jnp.arange(c)[None, :] + pad
    valid = (j >= 0) & (j < k)
    return jnp.where(valid, eca_w[jnp.clip(j, 0, k - 1)], 0.0).astype(jnp.float32)


def prepare_ca_res_block(params, W, *, residual=True, matmul_dtype=jnp.bfloat16):
    """Run ONCE per parameter set; returns concrete device arrays + config."""
    Cin, Cout = params['w1'].shape[2], params['w1'].shape[3]
    f32 = jnp.float32
    prep = {
        'W': W, 'Cin': Cin, 'Cout': Cout,
        'res_mode': ('identity' if Cin == Cout else 'conv') if residual else 'none',
        'w1b': _banded_conv_mats(params['w1'].astype(f32), W).astype(matmul_dtype),
        'b1f': jnp.tile(params['b1'].reshape(1, Cout).astype(f32), (1, W)),
        'w2b': _banded_conv_mats(params['w2'].astype(f32), W).astype(matmul_dtype),
        'b2f': jnp.tile(params['b2'].reshape(1, Cout).astype(f32), (1, W)),
        'big': jnp.kron(jnp.ones((W, W), f32),
                        _eca_band_matrix(params['eca_w'].astype(f32), Cout)
                        ).astype(matmul_dtype),
    }
    if prep['res_mode'] == 'conv':
        prep['wdflat'] = jnp.kron(jnp.eye(W, dtype=f32),
                                  params['wd'].astype(f32)).astype(matmul_dtype)
        prep['bdf'] = jnp.tile(params['bd'].reshape(1, Cout).astype(f32), (1, W))
    return {k: (jax.block_until_ready(v) if isinstance(v, jax.Array) else v)
            for k, v in prep.items()}


# ----------------------------------------------------------------------------
# Flat-layout entry point: (B, H, W*Cin) f32 -> (B, H, W*Cout) f32
# ----------------------------------------------------------------------------
def _pick_block_batch(B, H):
    Hp = H + 2
    divisors = [d for d in range(1, B + 1) if B % d == 0]
    fits = [d for d in divisors if d * Hp <= 256]       # fill MXU M up to ~256 rows
    bt = max(fits) if fits else 1
    if B // bt < 2:
        # v7x megacore: prefer >=2 parallel grid steps if M stays >= 64 rows
        alt = [d for d in divisors if B // d >= 2 and d * Hp >= 64]
        if alt:
            bt = max(alt)
    return bt


def ca_res_block_flat(x_flat, prep, *, block_batch=None):
    B, H, WCin = x_flat.shape
    W, Cin, Cout = prep['W'], prep['Cin'], prep['Cout']
    assert WCin == W * Cin
    WCo = W * Cout
    res_mode = prep['res_mode']

    Bt = block_batch if block_batch is not None else _pick_block_batch(B, H)
    assert B % Bt == 0, "block_batch must divide the batch"
    nb = B // Bt
    Hp = H + 2

    operands = [x_flat, prep['w1b'], prep['b1f'], prep['w2b'], prep['b2f'], prep['big']]
    in_specs = [
        pl.BlockSpec((Bt, H, WCin), lambda b: (b, 0, 0)),
        pl.BlockSpec((3, WCin, WCo), lambda b: (0, 0, 0)),
        pl.BlockSpec((1, WCo), lambda b: (0, 0)),
        pl.BlockSpec((3, WCo, WCo), lambda b: (0, 0, 0)),
        pl.BlockSpec((1, WCo), lambda b: (0, 0)),
        pl.BlockSpec((WCo, WCo), lambda b: (0, 0)),
    ]
    if res_mode == 'conv':
        operands += [prep['wdflat'], prep['bdf']]
        in_specs += [
            pl.BlockSpec((WCin, WCo), lambda b: (0, 0)),
            pl.BlockSpec((1, WCo), lambda b: (0, 0)),
        ]

    return pl.pallas_call(
        _make_ca_res_kernel(res_mode, Bt, H, W),
        out_shape=jax.ShapeDtypeStruct((B, H, WCo), jnp.float32),
        grid_spec=pltpu.PrefetchScalarGridSpec(
            num_scalar_prefetch=0,
            grid=(nb,),
            in_specs=in_specs,
            out_specs=pl.BlockSpec((Bt, H, WCo), lambda b: (b, 0, 0)),
            scratch_shapes=[
                pltpu.VMEM((Bt * Hp, WCin), jnp.float32),   # row-padded relu(x)
                pltpu.VMEM((Bt * Hp, WCo), jnp.float32),    # row-padded relu(y1)
            ],
        ),
        compiler_params=pltpu.CompilerParams(
            dimension_semantics=("parallel",),
            vmem_limit_bytes=32 * 1024 * 1024),
    )(*operands)


# ----------------------------------------------------------------------------
# NCHW convenience wrapper (drop-in parity with the PyTorch module)
# ----------------------------------------------------------------------------
def ca_res_block(x_nchw, params, *, residual=True, matmul_dtype=jnp.bfloat16,
                 prep=None, block_batch=None):
    B, Cin, H, W = x_nchw.shape
    if prep is None:
        prep = prepare_ca_res_block(params, W, residual=residual,
                                    matmul_dtype=matmul_dtype)
    Cout = prep['Cout']
    x_flat = (jnp.transpose(x_nchw, (0, 2, 3, 1))
              .reshape(B, H, W * Cin).astype(jnp.float32))
    out_flat = ca_res_block_flat(x_flat, prep, block_batch=block_batch)
    return jnp.transpose(out_flat.reshape(B, H, W, Cout), (0, 3, 1, 2))


# ----------------------------------------------------------------------------
# Pure-JAX reference matching the PyTorch forward
# ----------------------------------------------------------------------------
def reference_forward(x_nchw, p, *, residual=True):
    Cin = x_nchw.shape[1]
    Cout = p['w1'].shape[-1]
    x = jnp.transpose(x_nchw, (0, 2, 3, 1)).astype(jnp.float32)
    dn = ('NHWC', 'HWIO', 'NHWC')

    def conv3(v, w, b):
        y = jax.lax.conv_general_dilated(v, w, (1, 1), 'SAME',
                                         dimension_numbers=dn,
                                         precision=jax.lax.Precision.HIGHEST)
        return y + b

    r = x
    y = conv3(jax.nn.relu(x), p['w1'], p['b1'])
    y = conv3(jax.nn.relu(y), p['w2'], p['b2'])
    pooled = jnp.mean(y, axis=(1, 2))                      # (B, C)
    k = p['eca_w'].shape[0]
    pad = (k - 1) // 2
    pin = jnp.pad(pooled, ((0, 0), (pad, pad)))
    conv1d = sum(p['eca_w'][j] * pin[:, j:j + Cout] for j in range(k))
    att = jax.nn.sigmoid(conv1d)[:, None, None, :]
    if residual:
        if Cin == Cout:
            ds = r
        else:
            ds = jnp.einsum('bhwc,cd->bhwd', r, p['wd'],
                            precision=jax.lax.Precision.HIGHEST) + p['bd']
        y = y * att + ds
    else:
        y = y * att
    return jnp.transpose(y, (0, 3, 1, 2))


# ----------------------------------------------------------------------------
if __name__ == "__main__":
    B, in_dim, out_dim, H, W = 2, 4, 8, 16, 16

    # ECA kernel size, same formula as the PyTorch module
    t = int((abs(math.log2(out_dim)) + 1) // 2)
    k_eca = t if t % 2 else t + 1

    def make_params(key, ci, co):
        ks = jax.random.split(key, 7)
        return {
            'w1': jax.random.normal(ks[0], (3, 3, ci, co), jnp.float32) * 0.1,
            'b1': jax.random.normal(ks[1], (co,), jnp.float32) * 0.05,
            'w2': jax.random.normal(ks[2], (3, 3, co, co), jnp.float32) * 0.1,
            'b2': jax.random.normal(ks[3], (co,), jnp.float32) * 0.05,
            'eca_w': jax.random.normal(ks[4], (k_eca,), jnp.float32) * 0.5,
            'wd': jax.random.normal(ks[5], (ci, co), jnp.float32) * 0.1,
            'bd': jax.random.normal(ks[6], (co,), jnp.float32) * 0.05,
        }

    key = jax.random.PRNGKey(0)
    kp1, kp2, kx1, kx2 = jax.random.split(key, 4)

    ok = True

    # --- case 1: 1x1-conv residual (Cin != Cout); bf16 default + f32 check ------
    params = make_params(kp1, in_dim, out_dim)
    x = jax.random.normal(kx1, (B, in_dim, H, W), jnp.float32)
    ref = reference_forward(x, params, residual=True)

    prep_bf16 = prepare_ca_res_block(params, W, residual=True,
                                     matmul_dtype=jnp.bfloat16)   # one-time prep
    x_flat = jnp.transpose(x, (0, 2, 3, 1)).reshape(B, H, W * in_dim)
    out_flat = jax.block_until_ready(ca_res_block_flat(x_flat, prep_bf16))
    out = jnp.transpose(out_flat.reshape(B, H, W, out_dim), (0, 3, 1, 2))
    ok &= out.shape == (B, out_dim, H, W)
    ok &= float(jnp.max(jnp.abs(out - ref))) < 1e-1      # bf16 matmuls, f32 accum

    prep_f32 = prepare_ca_res_block(params, W, residual=True,
                                    matmul_dtype=jnp.float32)
    out32 = jax.block_until_ready(ca_res_block(x, params, residual=True,
                                               prep=prep_f32))
    ok &= float(jnp.max(jnp.abs(out32 - ref))) < 2e-3

    # --- case 2: identity residual (Cin == Cout) ---------------------------------
    params2 = make_params(kp2, out_dim, out_dim)
    x2 = jax.random.normal(kx2, (B, out_dim, H, W), jnp.float32)
    ref2 = reference_forward(x2, params2, residual=True)
    out2 = jax.block_until_ready(ca_res_block(x2, params2, residual=True))
    ok &= float(jnp.max(jnp.abs(out2 - ref2))) < 1e-1

    # --- case 3: no residual -------------------------------------------------------
    ref3 = reference_forward(x, params, residual=False)
    out3 = jax.block_until_ready(ca_res_block(x, params, residual=False))
    ok &= float(jnp.max(jnp.abs(out3 - ref3))) < 1e-1

    # --- case 4: forced multi-step grid (Bt=1) exercises the batch-tiled path -----
    out4 = jax.block_until_ready(ca_res_block(x, params, residual=True,
                                              prep=prep_bf16, block_batch=1))
    ok &= float(jnp.max(jnp.abs(out4 - ref))) < 1e-1

    print("KERNEL_OK" if ok else "MISMATCH")
</pallas_src>

<mosaic_0001>
module attributes {stable_mosaic.version = 11 : i64} {
  func.func @kernel(%arg0: i32, %arg1: memref<2x16x64xf32, #tpu.memory_space<vmem>>, %arg2: memref<3x64x128xbf16, #tpu.memory_space<vmem>>, %arg3: memref<1x128xf32, #tpu.memory_space<vmem>>, %arg4: memref<3x128x128xbf16, #tpu.memory_space<vmem>>, %arg5: memref<1x128xf32, #tpu.memory_space<vmem>>, %arg6: memref<128x128xbf16, #tpu.memory_space<vmem>>, %arg7: memref<64x128xbf16, #tpu.memory_space<vmem>>, %arg8: memref<1x128xf32, #tpu.memory_space<vmem>>, %arg9: memref<2x16x128xf32, #tpu.memory_space<vmem>>, %arg10: memref<36x64xf32, #tpu.memory_space<vmem>>, %arg11: memref<36x128xf32, #tpu.memory_space<vmem>>) attributes {dimension_semantics = [#tpu.dimension_semantics<parallel>], iteration_bounds = array<i64: 1>, scalar_prefetch = 0 : i64, scratch_operands = 2 : i64, tpu.core_type = #tpu.core_type<tc>, window_params = [{transform_indices = @transform_0, window_bounds = array<i64: 2, 16, 64>}, {pipeline_mode = #tpu.pipeline_mode<synchronous>, transform_indices = @transform_1, window_bounds = array<i64: 3, 64, 128>}, {pipeline_mode = #tpu.pipeline_mode<synchronous>, transform_indices = @transform_2, window_bounds = array<i64: 1, 128>}, {pipeline_mode = #tpu.pipeline_mode<synchronous>, transform_indices = @transform_3, window_bounds = array<i64: 3, 128, 128>}, {pipeline_mode = #tpu.pipeline_mode<synchronous>, transform_indices = @transform_4, window_bounds = array<i64: 1, 128>}, {pipeline_mode = #tpu.pipeline_mode<synchronous>, transform_indices = @transform_5, window_bounds = array<i64: 128, 128>}, {pipeline_mode = #tpu.pipeline_mode<synchronous>, transform_indices = @transform_6, window_bounds = array<i64: 64, 128>}, {pipeline_mode = #tpu.pipeline_mode<synchronous>, transform_indices = @transform_7, window_bounds = array<i64: 1, 128>}, {transform_indices = @transform_8, window_bounds = array<i64: 2, 16, 128>}]} {
    %cst = arith.constant 0.000000e+00 : f32
    %0 = vector.broadcast %cst : f32 to vector<1x64xf32>
    %c0 = arith.constant 0 : index
    %c0_0 = arith.constant 0 : index
    %1 = vector.load %arg10[%c0, %c0_0] : memref<36x64xf32, #tpu.memory_space<vmem>>, vector<1x64xf32>
    tpu.vector_store %arg10[%c0, %c0_0], %0 {strides = array<i32>} : memref<36x64xf32, #tpu.memory_space<vmem>>, vector<1x64xf32>,
    %c0_1 = arith.constant 0 : index
    %c0_2 = arith.constant 0 : index
    %c0_3 = arith.constant 0 : index
    %2 = vector.load %arg1[%c0_1, %c0_2, %c0_3] : memref<2x16x64xf32, #tpu.memory_space<vmem>>, vector<1x16x64xf32>
    %3 = vector.shape_cast %2 : vector<1x16x64xf32> to vector<16x64xf32>
    %cst_4 = arith.constant 0.000000e+00 : f32
    %4 = vector.broadcast %cst_4 : f32 to vector<16x64xf32>
    %5 = arith.maximumf %3, %4 : vector<16x64xf32>
    %c1 = arith.constant 1 : index
    %c0_5 = arith.constant 0 : index
    %6 = vector.load %arg10[%c1, %c0_5] : memref<36x64xf32, #tpu.memory_space<vmem>>, vector<16x64xf32>
    tpu.vector_store %arg10[%c1, %c0_5], %5 {strides = array<i32>} : memref<36x64xf32, #tpu.memory_space<vmem>>, vector<16x64xf32>,
    %c17 = arith.constant 17 : index
    %c0_6 = arith.constant 0 : index
    %7 = vector.load %arg10[%c17, %c0_6] : memref<36x64xf32, #tpu.memory_space<vmem>>, vector<1x64xf32>
    tpu.vector_store %arg10[%c17, %c0_6], %0 {strides = array<i32>} : memref<36x64xf32, #tpu.memory_space<vmem>>, vector<1x64xf32>,
    %c18 = arith.constant 18 : index
    %c0_7 = arith.constant 0 : index
    %8 = vector.load %arg10[%c18, %c0_7] : memref<36x64xf32, #tpu.memory_space<vmem>>, vector<1x64xf32>
    tpu.vector_store %arg10[%c18, %c0_7], %0 {strides = array<i32>} : memref<36x64xf32, #tpu.memory_space<vmem>>, vector<1x64xf32>,
    %c1_8 = arith.constant 1 : index
    %c0_9 = arith.constant 0 : index
    %c0_10 = arith.constant 0 : index
    %9 = vector.load %arg1[%c1_8, %c0_9, %c0_10] : memref<2x16x64xf32, #tpu.memory_space<vmem>>, vector<1x16x64xf32>
    %10 = vector.shape_cast %9 : vector<1x16x64xf32> to vector<16x64xf32>
    %cst_11 = arith.constant 0.000000e+00 : f32
    %11 = vector.broadcast %cst_11 : f32 to vector<16x64xf32>
    %12 = arith.maximumf %10, %11 : vector<16x64xf32>
    %c19 = arith.constant 19 : index
    %c0_12 = arith.constant 0 : index
    %13 = vector.load %arg10[%c19, %c0_12] : memref<36x64xf32, #tpu.memory_space<vmem>>, vector<16x64xf32>
    tpu.vector_store %arg10[%c19, %c0_12], %12 {strides = array<i32>} : memref<36x64xf32, #tpu.memory_space<vmem>>, vector<16x64xf32>,
    %c35 = arith.constant 35 : index
    %c0_13 = arith.constant 0 : index
    %14 = vector.load %arg10[%c35, %c0_13] : memref<36x64xf32, #tpu.memory_space<vmem>>, vector<1x64xf32>
    tpu.vector_store %arg10[%c35, %c0_13], %0 {strides = array<i32>} : memref<36x64xf32, #tpu.memory_space<vmem>>, vector<1x64xf32>,
    %cst_14 = arith.constant 0.000000e+00 : f32
    %15 = vector.broadcast %cst_14 : f32 to vector<34x128xf32>
    %c0_15 = arith.constant 0 : index
    %c0_16 = arith.constant 0 : index
    %16 = vector.load %arg10[%c0_15, %c0_16] : memref<36x64xf32, #tpu.memory_space<vmem>>, vector<34x64xf32>
    %17 = arith.truncf %16 : vector<34x64xf32> to vector<34x64xbf16>
    %c0_17 = arith.constant 0 : index
    %c0_18 = arith.constant 0 : index
    %c0_19 = arith.constant 0 : index
    %18 = vector.load %arg2[%c0_17, %c0_18, %c0_19] : memref<3x64x128xbf16, #tpu.memory_space<vmem>>, vector<1x64x128xbf16>
    %19 = vector.shape_cast %18 : vector<1x64x128xbf16> to vector<64x128xbf16>
    %cst_20 = arith.constant dense<0.000000e+00> : vector<34x128xf32>
    %20 = tpu.matmul %17, %19, %cst_20 {dimension_numbers = #tpu.dot_dimension_numbers<[1], [0], [0], [1], [0, 0, 1, 1], [], []>} : vector<34x64xbf16>, vector<64x128xbf16>, vector<34x128xf32> -> vector<34x128xf32>
    %21 = arith.addf %15, %20 : vector<34x128xf32>
    %c1_21 = arith.constant 1 : index
    %c0_22 = arith.constant 0 : index
    %22 = vector.load %arg10[%c1_21, %c0_22] : memref<36x64xf32, #tpu.memory_space<vmem>>, vector<34x64xf32>
    %23 = arith.truncf %22 : vector<34x64xf32> to vector<34x64xbf16>
    %c1_23 = arith.constant 1 : index
    %c0_24 = arith.constant 0 : index
    %c0_25 = arith.constant 0 : index
    %24 = vector.load %arg2[%c1_23, %c0_24, %c0_25] : memref<3x64x128xbf16, #tpu.memory_space<vmem>>, vector<1x64x128xbf16>
    %25 = vector.shape_cast %24 : vector<1x64x128xbf16> to vector<64x128xbf16>
    %cst_26 = arith.constant dense<0.000000e+00> : vector<34x128xf32>
    %26 = tpu.matmul %23, %25, %cst_26 {dimension_numbers = #tpu.dot_dimension_numbers<[1], [0], [0], [1], [0, 0, 1, 1], [], []>} : vector<34x64xbf16>, vector<64x128xbf16>, vector<34x128xf32> -> vector<34x128xf32>
    %27 = arith.addf %21, %26 : vector<34x128xf32>
    %c2 = arith.constant 2 : index
    %c0_27 = arith.constant 0 : index
    %28 = vector.load %arg10[%c2, %c0_27] : memref<36x64xf32, #tpu.memory_space<vmem>>, vector<34x64xf32>
    %29 = arith.truncf %28 : vector<34x64xf32> to vector<34x64xbf16>
    %c2_28 = arith.constant 2 : index
    %c0_29 = arith.constant 0 : index
    %c0_30 = arith.constant 0 : index
    %30 = vector.load %arg2[%c2_28, %c0_29, %c0_30] : memref<3x64x128xbf16, #tpu.memory_space<vmem>>, vector<1x64x128xbf16>
    %31 = vector.shape_cast %30 : vector<1x64x128xbf16> to vector<64x128xbf16>
    %cst_31 = arith.constant dense<0.000000e+00> : vector<34x128xf32>
    %32 = tpu.matmul %29, %31, %cst_31 {dimension_numbers = #tpu.dot_dimension_numbers<[1], [0], [0], [1], [0, 0, 1, 1], [], []>} : vector<34x64xbf16>, vector<64x128xbf16>, vector<34x128xf32> -> vector<34x128xf32>
    %33 = arith.addf %27, %32 : vector<34x128xf32>
    %c0_32 = arith.constant 0 : index
    %c0_33 = arith.constant 0 : index
    %34 = vector.load %arg3[%c0_32, %c0_33] : memref<1x128xf32, #tpu.memory_space<vmem>>, vector<1x128xf32>
    %cst_34 = arith.constant 0.000000e+00 : f32
    %35 = vector.broadcast %cst_34 : f32 to vector<1x128xf32>
    %c0_35 = arith.constant 0 : index
    %c0_36 = arith.constant 0 : index
    %36 = vector.load %arg11[%c0_35, %c0_36] : memref<36x128xf32, #tpu.memory_space<vmem>>, vector<1x128xf32>
    tpu.vector_store %arg11[%c0_35, %c0_36], %35 {strides = array<i32>} : memref<36x128xf32, #tpu.memory_space<vmem>>, vector<1x128xf32>,
    %37 = vector.extract_strided_slice %33 {offsets = [0, 0], sizes = [16, 128], strides = [1, 1]} : vector<34x128xf32> to vector<16x128xf32>
    %38 = vector.broadcast %34 : vector<1x128xf32> to vector<16x128xf32>
    %39 = arith.addf %37, %38 : vector<16x128xf32>
    %cst_37 = arith.constant 0.000000e+00 : f32
    %40 = vector.broadcast %cst_37 : f32 to vector<16x128xf32>
    %41 = arith.maximumf %39, %40 : vector<16x128xf32>
    %c1_38 = arith.constant 1 : index
    %c0_39 = arith.constant 0 : index
    %42 = vector.load %arg11[%c1_38, %c0_39] : memref<36x128xf32, #tpu.memory_space<vmem>>, vector<16x128xf32>
    tpu.vector_store %arg11[%c1_38, %c0_39], %41 {strides = array<i32>} : memref<36x128xf32, #tpu.memory_space<vmem>>, vector<16x128xf32>,
    %c17_40 = arith.constant 17 : index
    %c0_41 = arith.constant 0 : index
    %43 = vector.load %arg11[%c17_40, %c0_41] : memref<36x128xf32, #tpu.memory_space<vmem>>, vector<1x128xf32>
    tpu.vector_store %arg11[%c17_40, %c0_41], %35 {strides = array<i32>} : memref<36x128xf32, #tpu.memory_space<vmem>>, vector<1x128xf32>,
    %c18_42 = arith.constant 18 : index
    %c0_43 = arith.constant 0 : index
    %44 = vector.load %arg11[%c18_42, %c0_43] : memref<36x128xf32, #tpu.memory_space<vmem>>, vector<1x128xf32>
    tpu.vector_store %arg11[%c18_42, %c0_43], %35 {strides = array<i32>} : memref<36x128xf32, #tpu.memory_space<vmem>>, vector<1x128xf32>,
    %45 = vector.extract_strided_slice %33 {offsets = [18, 0], sizes = [16, 128], strides = [1, 1]} : vector<34x128xf32> to vector<16x128xf32>
    %46 = vector.broadcast %34 : vector<1x128xf32> to vector<16x128xf32>
    %47 = arith.addf %45, %46 : vector<16x128xf32>
    %cst_44 = arith.constant 0.000000e+00 : f32
    %48 = vector.broadcast %cst_44 : f32 to vector<16x128xf32>
    %49 = arith.maximumf %47, %48 : vector<16x128xf32>
    %c19_45 = arith.constant 19 : index
    %c0_46 = arith.constant 0 : index
    %50 = vector.load %arg11[%c19_45, %c0_46] : memref<36x128xf32, #tpu.memory_space<vmem>>, vector<16x128xf32>
    tpu.vector_store %arg11[%c19_45, %c0_46], %49 {strides = array<i32>} : memref<36x128xf32, #tpu.memory_space<vmem>>, vector<16x128xf32>,
    %c35_47 = arith.constant 35 : index
    %c0_48 = arith.constant 0 : index
    %51 = vector.load %arg11[%c35_47, %c0_48] : memref<36x128xf32, #tpu.memory_space<vmem>>, vector<1x128xf32>
    tpu.vector_store %arg11[%c35_47, %c0_48], %35 {strides = array<i32>} : memref<36x128xf32, #tpu.memory_space<vmem>>, vector<1x128xf32>,
    %cst_49 = arith.constant 0.000000e+00 : f32
    %52 = vector.broadcast %cst_49 : f32 to vector<34x128xf32>
    %c0_50 = arith.constant 0 : index
    %c0_51 = arith.constant 0 : index
    %53 = vector.load %arg11[%c0_50, %c0_51] : memref<36x128xf32, #tpu.memory_space<vmem>>, vector<34x128xf32>
    %54 = arith.truncf %53 : vector<34x128xf32> to vector<34x128xbf16>
    %c0_52 = arith.constant 0 : index
    %c0_53 = arith.constant 0 : index
    %c0_54 = arith.constant 0 : index
    %55 = vector.load %arg4[%c0_52, %c0_53, %c0_54] : memref<3x128x128xbf16, #tpu.memory_space<vmem>>, vector<1x128x128xbf16>
    %56 = vector.shape_cast %55 : vector<1x128x128xbf16> to vector<128x128xbf16>
    %cst_55 = arith.constant dense<0.000000e+00> : vector<34x128xf32>
    %57 = tpu.matmul %54, %56, %cst_55 {dimension_numbers = #tpu.dot_dimension_numbers<[1], [0], [0], [1], [0, 0, 1, 1], [], []>} : vector<34x128xbf16>, vector<128x128xbf16>, vector<34x128xf32> -> vector<34x128xf32>
    %58 = arith.addf %52, %57 : vector<34x128xf32>
    %c1_56 = arith.constant 1 : index
    %c0_57 = arith.constant 0 : index
    %59 = vector.load %arg11[%c1_56, %c0_57] : memref<36x128xf32, #tpu.memory_space<vmem>>, vector<34x128xf32>
    %60 = arith.truncf %59 : vector<34x128xf32> to vector<34x128xbf16>
    %c1_58 = arith.constant 1 : index
    %c0_59 = arith.constant 0 : index
    %c0_60 = arith.constant 0 : index
    %61 = vector.load %arg4[%c1_58, %c0_59, %c0_60] : memref<3x128x128xbf16, #tpu.memory_space<vmem>>, vector<1x128x128xbf16>
    %62 = vector.shape_cast %61 : vector<1x128x128xbf16> to vector<128x128xbf16>
    %cst_61 = arith.constant dense<0.000000e+00> : vector<34x128xf32>
    %63 = tpu.matmul %60, %62, %cst_61 {dimension_numbers = #tpu.dot_dimension_numbers<[1], [0], [0], [1], [0, 0, 1, 1], [], []>} : vector<34x128xbf16>, vector<128x128xbf16>, vector<34x128xf32> -> vector<34x128xf32>
    %64 = arith.addf %58, %63 : vector<34x128xf32>
    %c2_62 = arith.constant 2 : index
    %c0_63 = arith.constant 0 : index
    %65 = vector.load %arg11[%c2_62, %c0_63] : memref<36x128xf32, #tpu.memory_space<vmem>>, vector<34x128xf32>
    %66 = arith.truncf %65 : vector<34x128xf32> to vector<34x128xbf16>
    %c2_64 = arith.constant 2 : index
    %c0_65 = arith.constant 0 : index
    %c0_66 = arith.constant 0 : index
    %67 = vector.load %arg4[%c2_64, %c0_65, %c0_66] : memref<3x128x128xbf16, #tpu.memory_space<vmem>>, vector<1x128x128xbf16>
    %68 = vector.shape_cast %67 : vector<1x128x128xbf16> to vector<128x128xbf16>
    %cst_67 = arith.constant dense<0.000000e+00> : vector<34x128xf32>
    %69 = tpu.matmul %66, %68, %cst_67 {dimension_numbers = #tpu.dot_dimension_numbers<[1], [0], [0], [1], [0, 0, 1, 1], [], []>} : vector<34x128xbf16>, vector<128x128xbf16>, vector<34x128xf32> -> vector<34x128xf32>
    %70 = arith.addf %64, %69 : vector<34x128xf32>
    %c0_68 = arith.constant 0 : index
    %c0_69 = arith.constant 0 : index
    %71 = vector.load %arg5[%c0_68, %c0_69] : memref<1x128xf32, #tpu.memory_space<vmem>>, vector<1x128xf32>
    %72 = vector.extract_strided_slice %70 {offsets = [0, 0], sizes = [16, 128], strides = [1, 1]} : vector<34x128xf32> to vector<16x128xf32>
    %73 = vector.broadcast %71 : vector<1x128xf32> to vector<16x128xf32>
    %74 = arith.addf %72, %73 : vector<16x128xf32>
    %75 = vector.extract_strided_slice %70 {offsets = [18, 0], sizes = [16, 128], strides = [1, 1]} : vector<34x128xf32> to vector<16x128xf32>
    %76 = vector.broadcast %71 : vector<1x128xf32> to vector<16x128xf32>
    %77 = arith.addf %75, %76 : vector<16x128xf32>
    %cst_70 = arith.constant dense<0.000000e+00> : vector<128xf32>
    %78 = vector.multi_reduction <add>, %74, %cst_70 [0] : vector<16x128xf32> to vector<128xf32>
    %79 = vector.shape_cast %78 : vector<128xf32> to vector<1x128xf32>
    %cst_71 = arith.constant dense<0.000000e+00> : vector<128xf32>
    %80 = vector.multi_reduction <add>, %77, %cst_71 [0] : vector<16x128xf32> to vector<128xf32>
    %81 = vector.shape_cast %80 : vector<128xf32> to vector<1x128xf32>
    %82 = tpu.concatenate %79, %81 in 0 : vector<1x128xf32>, vector<1x128xf32> -> vector<2x128xf32>
    %cst_72 = arith.constant 3.906250e-03 : f32
    %83 = vector.broadcast %cst_72 : f32 to vector<2x128xf32>
    %84 = arith.mulf %82, %83 : vector<2x128xf32>
    %85 = arith.truncf %84 : vector<2x128xf32> to vector<2x128xbf16>
    %c0_73 = arith.constant 0 : index
    %c0_74 = arith.constant 0 : index
    %86 = vector.load %arg6[%c0_73, %c0_74] : memref<128x128xbf16, #tpu.memory_space<vmem>>, vector<128x128xbf16>
    %cst_75 = arith.constant dense<0.000000e+00> : vector<2x128xf32>
    %87 = tpu.matmul %85, %86, %cst_75 {dimension_numbers = #tpu.dot_dimension_numbers<[1], [0], [0], [1], [0, 0, 1, 1], [], []>} : vector<2x128xbf16>, vector<128x128xbf16>, vector<2x128xf32> -> vector<2x128xf32>
    %88 = arith.negf %87 : vector<2x128xf32>
    %89 = math.exp %88 : vector<2x128xf32>
    %cst_76 = arith.constant 1.000000e+00 : f32
    %90 = vector.broadcast %cst_76 : f32 to vector<2x128xf32>
    %91 = arith.addf %90, %89 : vector<2x128xf32>
    %92 = arith.divf %90, %91 : vector<2x128xf32>
    %c0_77 = arith.constant 0 : index
    %c0_78 = arith.constant 0 : index
    %c0_79 = arith.constant 0 : index
    %93 = vector.load %arg1[%c0_77, %c0_78, %c0_79] : memref<2x16x64xf32, #tpu.memory_space<vmem>>, vector<2x16x64xf32>
    %94 = vector.shape_cast %93 : vector<2x16x64xf32> to vector<32x64xf32>
    %95 = arith.truncf %94 : vector<32x64xf32> to vector<32x64xbf16>
    %c0_80 = arith.constant 0 : index
    %c0_81 = arith.constant 0 : index
    %96 = vector.load %arg7[%c0_80, %c0_81] : memref<64x128xbf16, #tpu.memory_space<vmem>>, vector<64x128xbf16>
    %cst_82 = arith.constant dense<0.000000e+00> : vector<32x128xf32>
    %97 = tpu.matmul %95, %96, %cst_82 {dimension_numbers = #tpu.dot_dimension_numbers<[1], [0], [0], [1], [0, 0, 1, 1], [], []>} : vector<32x64xbf16>, vector<64x128xbf16>, vector<32x128xf32> -> vector<32x128xf32>
    %c0_83 = arith.constant 0 : index
    %c0_84 = arith.constant 0 : index
    %98 = vector.load %arg8[%c0_83, %c0_84] : memref<1x128xf32, #tpu.memory_space<vmem>>, vector<1x128xf32>
    %99 = vector.broadcast %98 : vector<1x128xf32> to vector<32x128xf32>
    %100 = arith.addf %97, %99 : vector<32x128xf32>
    %101 = vector.extract_strided_slice %92 {offsets = [0, 0], sizes = [1, 128], strides = [1, 1]} : vector<2x128xf32> to vector<1x128xf32>
    %102 = vector.broadcast %101 : vector<1x128xf32> to vector<16x128xf32>
    %103 = arith.mulf %74, %102 : vector<16x128xf32>
    %104 = vector.extract_strided_slice %100 {offsets = [0, 0], sizes = [16, 128], strides = [1, 1]} : vector<32x128xf32> to vector<16x128xf32>
    %105 = arith.addf %103, %104 : vector<16x128xf32>
    %c0_85 = arith.constant 0 : index
    %c0_86 = arith.constant 0 : index
    %c0_87 = arith.constant 0 : index
    %106 = vector.load %arg9[%c0_85, %c0_86, %c0_87] : memref<2x16x128xf32, #tpu.memory_space<vmem>>, vector<1x16x128xf32>
    %107 = vector.shape_cast %106 : vector<1x16x128xf32> to vector<16x128xf32>
    %108 = vector.shape_cast %105 : vector<16x128xf32> to vector<1x16x128xf32>
    tpu.vector_store %arg9[%c0_85, %c0_86, %c0_87], %108 {strides = array<i32>} : memref<2x16x128xf32, #tpu.memory_space<vmem>>, vector<1x16x128xf32>,
    %109 = vector.extract_strided_slice %92 {offsets = [1, 0], sizes = [1, 128], strides = [1, 1]} : vector<2x128xf32> to vector<1x128xf32>
    %110 = vector.broadcast %109 : vector<1x128xf32> to vector<16x128xf32>
    %111 = arith.mulf %77, %110 : vector<16x128xf32>
    %112 = vector.extract_strided_slice %100 {offsets = [16, 0], sizes = [16, 128], strides = [1, 1]} : vector<32x128xf32> to vector<16x128xf32>
    %113 = arith.addf %111, %112 : vector<16x128xf32>
    %c1_88 = arith.constant 1 : index
    %c0_89 = arith.constant 0 : index
    %c0_90 = arith.constant 0 : index
    %114 = vector.load %arg9[%c1_88, %c0_89, %c0_90] : memref<2x16x128xf32, #tpu.memory_space<vmem>>, vector<1x16x128xf32>
    %115 = vector.shape_cast %114 : vector<1x16x128xf32> to vector<16x128xf32>
    %116 = vector.shape_cast %113 : vector<16x128xf32> to vector<1x16x128xf32>
    tpu.vector_store %arg9[%c1_88, %c0_89, %c0_90], %116 {strides = array<i32>} : memref<2x16x128xf32, #tpu.memory_space<vmem>>, vector<1x16x128xf32>,
    return
  }
  func.func @transform_0(%arg0: i32) -> (i32, i32, i32) {
    %c0_i32 = arith.constant 0 : i32
    %c0_i32_0 = arith.constant 0 : i32
    %c0_i32_1 = arith.constant 0 : i32
    return %arg0, %c0_i32, %c0_i32_0 : i32, i32, i32
  }
  func.func @transform_1(%arg0: i32) -> (i32, i32, i32) {
    %c0_i32 = arith.constant 0 : i32
    %c0_i32_0 = arith.constant 0 : i32
    %c0_i32_1 = arith.constant 0 : i32
    %c0_i32_2 = arith.constant 0 : i32
    return %c0_i32, %c0_i32_0, %c0_i32_1 : i32, i32, i32
  }
  func.func @transform_2(%arg0: i32) -> (i32, i32) {
    %c0_i32 = arith.constant 0 : i32
    %c0_i32_0 = arith.constant 0 : i32
    %c0_i32_1 = arith.constant 0 : i32
    return %c0_i32, %c0_i32_0 : i32, i32
  }
  func.func @transform_3(%arg0: i32) -> (i32, i32, i32) {
    %c0_i32 = arith.constant 0 : i32
    %c0_i32_0 = arith.constant 0 : i32
    %c0_i32_1 = arith.constant 0 : i32
    %c0_i32_2 = arith.constant 0 : i32
    return %c0_i32, %c0_i32_0, %c0_i32_1 : i32, i32, i32
  }
  func.func @transform_4(%arg0: i32) -> (i32, i32) {
    %c0_i32 = arith.constant 0 : i32
    %c0_i32_0 = arith.constant 0 : i32
    %c0_i32_1 = arith.constant 0 : i32
    return %c0_i32, %c0_i32_0 : i32, i32
  }
  func.func @transform_5(%arg0: i32) -> (i32, i32) {
    %c0_i32 = arith.constant 0 : i32
    %c0_i32_0 = arith.constant 0 : i32
    %c0_i32_1 = arith.constant 0 : i32
    return %c0_i32, %c0_i32_0 : i32, i32
  }
  func.func @transform_6(%arg0: i32) -> (i32, i32) {
    %c0_i32 = arith.constant 0 : i32
    %c0_i32_0 = arith.constant 0 : i32
    %c0_i32_1 = arith.constant 0 : i32
    return %c0_i32, %c0_i32_0 : i32, i32
  }
  func.func @transform_7(%arg0: i32) -> (i32, i32) {
    %c0_i32 = arith.constant 0 : i32
    %c0_i32_0 = arith.constant 0 : i32
    %c0_i32_1 = arith.constant 0 : i32
    return %c0_i32, %c0_i32_0 : i32, i32
  }
  func.func @transform_8(%arg0: i32) -> (i32, i32, i32) {
    %c0_i32 = arith.constant 0 : i32
    %c0_i32_0 = arith.constant 0 : i32
    %c0_i32_1 = arith.constant 0 : i32
    return %arg0, %c0_i32, %c0_i32_0 : i32, i32, i32
  }
}

</mosaic_0001>

<bundles_post_ra>
// kernel: tpu_custom_call.1
= control target key start
LH: loop header
LB: loop body
LE: loop exit
PB: predicated region body
PF: predicated region fallthrough
CT: control target
= control target key end

     0   :  { %13 = vsyncpa [#allocation5], 0  ;;  %s1957_s0 = inlined_call_operand.hbm [shape: f32[2,16,64], index: 0, kind: input, shape index: {}]   ;;  %s1958_s1 = inlined_call_operand.hbm [shape: bf16[3,64,128], index: 1, kind: input, shape index: {}]   ;;  %s1959_s2 = inlined_call_operand.vmem [shape: f32[1,128], index: 2, kind: input, shape index: {}]   ;;  %s1960_s3 = inlined_call_operand.hbm [shape: bf16[3,128,128], index: 3, kind: input, shape index: {}]   ;;  %s1961_s4 = inlined_call_operand.vmem [shape: f32[1,128], index: 4, kind: input, shape index: {}]   ;;  %s1962_s5 = inlined_call_operand.hbm [shape: bf16[128,128], index: 5, kind: input, shape index: {}]   ;;  %s1963_s6 = inlined_call_operand.hbm [shape: bf16[64,128], index: 6, kind: input, shape index: {}]   ;;  %s1964_s7 = inlined_call_operand.vmem [shape: f32[1,128], index: 7, kind: input, shape index: {}]   ;;  %s1965_s8 = inlined_call_operand.hbm [shape: f32[2,16,128], index: 8, kind: output, shape index: {}]  }
   0x1   :  { %14 = vsyncpa [#allocation8], 0 }
   0x2   :  { %15 = vsyncpa [#allocation11], 0 }
   0x3   :  { %16 = vsyncpa [#allocation6], 0  ;;  %s1672_s27 = smov [#allocation7]   ;;  %s1532_s9 = scalar_lea.hbm %s1958_s1, 1536 }
   0x4   :  { %s34_s28 = sshll.u32 %s1672_s27, 4  ;;  %p1533_p0 = scmp.ne.s32.totalorder %s1958_s1, %s1532_s9  ;;  %s35_s28 = int_to_ptr.vmem [resolvable:$true] %s34_s28 }
   0x5   :  { %p1536_p1 = scmp.lt.u32.totalorder %s1532_s9, %s1958_s1 }
   0x7   :  { %p1538_p2 = pnand %p1536_p1, %p1533_p0 }
   0x9   :  { %1541 = shalt.err (!%p1538_p2)
}
   0xa   :  { %s1542_s14 = scalar_lea.vmem %s35_s28, 1536  ;;  %p1547_p4 = scmp.lt.s32.totalorder %s35_s28, %s35_s28 }
   0xb   :  { %p1543_p3 = scmp.ne.s32.totalorder %s35_s28, %s1542_s14  ;;  %p1548_p5 = scmp.lt.s32.totalorder %s1542_s14, %s1542_s14 }
   0xd   :  { %p1549_p6 = por %p1548_p5, %p1547_p4 }
   0xf   :  { %p1550_p7 = pnand %p1549_p6, %p1543_p3 }
  0x11   :  { %1553 = shalt.err (!%p1550_p7)
}
  0x12   :  { %s1673_s15 = smov 64   ;;  %s1674_s16 = smov 4  }
  0x13   :  { %40 = dma.hbm_to_vmem [thread:$0]  %s1958_s1, 1536, %s35_s28, [#allocation8], %s1673_s15, %s1673_s15, %s1674_s16  }
  0x14   :  { %s1675_s19 = smov [#allocation10]   ;;  %s1676_s21 = smov [#allocation4]  }
  0x15   :  { %s62_s20 = sshll.u32 %s1675_s19, 4  ;;  %s22_s22 = sshll.u32 %s1676_s21, 4  ;;  %s63_s20 = int_to_ptr.vmem [resolvable:$true] %s62_s20  ;;  %s23_s22 = int_to_ptr.vmem [resolvable:$true] %s22_s22 }
  0x16   :  { %s1554_s25 = scalar_lea.hbm %s1962_s5, 1024 }
  0x17   :  { %p1555_p8 = scmp.ne.s32.totalorder %s1962_s5, %s1554_s25  ;;  %p1558_p9 = scmp.lt.u32.totalorder %s1554_s25, %s1962_s5 }
  0x19   :  { %p1560_p10 = pnand %p1558_p9, %p1555_p8 }
  0x1b   :  { %1563 = shalt.err (!%p1560_p10)
}
  0x1c   :  { %s1564_s1 = scalar_lea.vmem %s63_s20, 1024  ;;  %p1569_p12 = scmp.lt.s32.totalorder %s63_s20, %s63_s20 }
  0x1d   :  { %p1565_p11 = scmp.ne.s32.totalorder %s63_s20, %s1564_s1  ;;  %p1570_p13 = scmp.lt.s32.totalorder %s1564_s1, %s1564_s1 }
  0x1f   :  { %p1571_p0 = por %p1570_p13, %p1569_p12 }
  0x21   :  { %p1572_p1 = pnand %p1571_p0, %p1565_p11 }
  0x23   :  { %1575 = shalt.err (!%p1572_p1)
}
  0x24   :  { %68 = dma.hbm_to_vmem [thread:$0]  %s1962_s5, 1024, %s63_s20, [#allocation11], %s1673_s15, %s1673_s15, %s1674_s16  }
  0x25   :  { %s1576_s12 = scalar_lea.hbm %s1957_s0, 512 }
  0x26   :  { %p1577_p2 = scmp.ne.s32.totalorder %s1957_s0, %s1576_s12  ;;  %p1580_p3 = scmp.lt.u32.totalorder %s1576_s12, %s1957_s0 }
  0x28   :  { %p1582_p4 = pnand %p1580_p3, %p1577_p2 }
  0x2a   :  { %1585 = shalt.err (!%p1582_p4)
}
  0x2b   :  { %s1586_s19 = scalar_lea.vmem %s23_s22, 512  ;;  %p1591_p6 = scmp.lt.s32.totalorder %s23_s22, %s23_s22 }
  0x2c   :  { %p1587_p5 = scmp.ne.s32.totalorder %s23_s22, %s1586_s19  ;;  %p1592_p7 = scmp.lt.s32.totalorder %s1586_s19, %s1586_s19 }
  0x2e   :  { %p1593_p8 = por %p1592_p7, %p1591_p6 }
  0x30   :  { %p1594_p9 = pnand %p1593_p8, %p1587_p5 }
  0x32   :  { %1597 = shalt.err (!%p1594_p9)
}
  0x33   :  { %s1677_s5 = smov 128   ;;  %s1678_s20 = smov 8  }
  0x34   :  { %28 = dma.hbm_to_vmem [thread:$0]  %s1957_s0, 512, %s23_s22, [#allocation5], %s1677_s5, %s1677_s5, %s1678_s20  }
  0x35   :  { %s1679_s24 = smov [#allocation9]   ;;  %s1680_s26 = smov [#allocation12]  }
  0x36   :  { %s48_s25 = sshll.u32 %s1679_s24, 4  ;;  %s74_s27 = sshll.u32 %s1680_s26, 4  ;;  %s49_s25 = int_to_ptr.vmem [resolvable:$true] %s48_s25  ;;  %s75_s27 = int_to_ptr.vmem [resolvable:$true] %s74_s27 }
  0x37   :  { %s1598_s1 = scalar_lea.hbm %s1960_s3, 3072 }
  0x38   :  { %p1599_p10 = scmp.ne.s32.totalorder %s1960_s3, %s1598_s1  ;;  %p1602_p11 = scmp.lt.u32.totalorder %s1598_s1, %s1960_s3 }
  0x3a   :  { %p1604_p12 = pnand %p1602_p11, %p1599_p10 }
  0x3c   :  { %1607 = shalt.err (!%p1604_p12)
}
  0x3d   :  { %s1608_s0 = scalar_lea.vmem %s49_s25, 3072  ;;  %p1613_p0 = scmp.lt.s32.totalorder %s49_s25, %s49_s25 }
  0x3e   :  { %p1609_p13 = scmp.ne.s32.totalorder %s49_s25, %s1608_s0  ;;  %p1614_p1 = scmp.lt.s32.totalorder %s1608_s0, %s1608_s0 }
  0x40   :  { %p1615_p2 = por %p1614_p1, %p1613_p0 }
  0x42   :  { %p1616_p3 = pnand %p1615_p2, %p1609_p13 }
  0x44   :  { %1619 = shalt.err (!%p1616_p3)
}
  0x45   :  { %54 = dma.hbm_to_vmem [thread:$0]  %s1960_s3, 3072, %s49_s25, [#allocation8], %s1673_s15, %s1673_s15, %s1674_s16  }
  0x46   :  { %s1620_s17 = scalar_lea.hbm %s1963_s6, 512 }
  0x47   :  { %p1621_p4 = scmp.ne.s32.totalorder %s1963_s6, %s1620_s17  ;;  %p1624_p5 = scmp.lt.u32.totalorder %s1620_s17, %s1963_s6 }
  0x49   :  { %p1626_p6 = pnand %p1624_p5, %p1621_p4 }
  0x4b   :  { %1629 = shalt.err (!%p1626_p6)
}
  0x4c   :  { %s1630_s24 = scalar_lea.vmem %s75_s27, 512  ;;  %p1635_p8 = scmp.lt.s32.totalorder %s75_s27, %s75_s27 }
  0x4d   :  { %p1631_p7 = scmp.ne.s32.totalorder %s75_s27, %s1630_s24  ;;  %p1636_p9 = scmp.lt.s32.totalorder %s1630_s24, %s1630_s24 }
  0x4f   :  { %p1637_p10 = por %p1636_p9, %p1635_p8 }
  0x51   :  { %p1638_p11 = pnand %p1637_p10, %p1631_p7 }
  0x53   :  { %1641 = shalt.err (!%p1638_p11)
}
  0x54   :  { %80 = dma.hbm_to_vmem [thread:$0]  %s1963_s6, 512, %s75_s27, [#allocation11], %s1673_s15, %s1673_s15, %s1674_s16  }
  0x55   :  { %1664 = dma.done.wait [#allocation5], 512  }
  0x56   :  { %1665 = vsyncadd [#allocation5], 4294966784 }
  0x57   :  { %1666 = dma.done.wait [#allocation8], 4608  }
  0x58   :  { %1667 = vsyncadd [#allocation8], 4294962688 }
  0x59   :  { %1668 = dma.done.wait [#allocation11], 1536  }
  0x5a   :  { %1669 = vsyncadd [#allocation11], 4294965760  ;;  %vm99_vm0 = vcmask 516096   ;;  %v1681_v0 = vmov 0.0   ;;  %vm1682_vm1 = vmmov 0   ;;  %v1480_v1 = vld [vmem:[#allocation7 + $0x20] sm:$0xff]  }
  0x5b   :  { %1292 = vmatprep.subr.bf16.mxu0 %v1681_v0  ;;  %441 = vst [vmem:[#allocation3] sm:$0x1] %v1681_v0  ;;  %454 = vst [vmem:[#allocation3 + $0x11] sm:$0x1] %v1681_v0  ;;  %1312 = vmatprep.subr.bf16.mxu1 %v1681_v0  ;;  %v1481_v2 = vld [vmem:[#allocation7] sm:$0xff]   ;;  %v1482_v3 = vld [vmem:[#allocation7 + $0x28] sm:$0xff]  }
  0x5c   :  { %455 = vst [vmem:[#allocation3 + $0x12] sm:$0x1] %v1681_v0  ;;  %465 = vst [vmem:[#allocation3 + $0x23] sm:$0x1] %v1681_v0  ;;  %1300 = vmatprep.mubr.msk.bf16.mxu0 %vm1682_vm1, %v1681_v0  ;;  %1320 = vmatprep.mubr.msk.bf16.mxu1 %vm1682_vm1, %v1681_v0  ;;  %v1483_v4 = vld [vmem:[#allocation7 + $0x8] sm:$0xff]   ;;  %v1484_v5 = vld [vmem:[#allocation7 + $0x30] sm:$0xff]  }
  0x5d   :  { %100 = vst.msk [vmem:[#allocation2] sm:$0x1] %vm99_vm0, %v1681_v0  ;;  %108 = vst.msk [vmem:[#allocation2 + $0x11] sm:$0x1] %vm99_vm0, %v1681_v0  ;;  %1293 = vmatpush3.bf16.msra.mxu0 %v1480_v1  ;;  %1313 = vmatpush3.bf16.msra.mxu1 %v1481_v2  ;;  %v1485_v6 = vld [vmem:[#allocation7 + $0x10] sm:$0xff]   ;;  %v1822_v7 = vld [vmem:[#allocation4] sm:$0xff] }
  0x5e   :  { %109 = vst.msk [vmem:[#allocation2 + $0x12] sm:$0x1] %vm99_vm0, %v1681_v0  ;;  %117 = vst.msk [vmem:[#allocation2 + $0x23] sm:$0x1] %vm99_vm0, %v1681_v0  ;;  %1294 = vmatprep.subr.bf16.mxu0 %v1681_v0  ;;  %1314 = vmatprep.subr.bf16.mxu1 %v1681_v0  ;;  %v1824_v8 = vld [vmem:[#allocation4 + $0x8] sm:$0xff]  ;;  %vm105_vm2 = vcmask 523264  }
  0x5f   :  { %v1486_v9 = vld [vmem:[#allocation7 + $0x38] sm:$0xff]   ;;  %v103_v11 = vmax.f32 %v1822_v7, 0.0  ;;  %v104_v12 = vmax.f32 %v1824_v8, 0.0  ;;  %v1828_v13 = vld [vmem:[#allocation4 + $0x10] sm:$0xff]  ;;  %v1488_v17 = vld [vmem:[#allocation7 + $0x40] sm:$0xff]   ;;  %vm879_vm3 = vcmask 1045504  }
  0x60   :  { %v1487_v10 = vld [vmem:[#allocation7 + $0x18] sm:$0xff]   ;;  %v113_v15 = vmax.f32 %v1828_v13, 0.0  ;;  %v1489_v24 = vld [vmem:[#allocation7 + $0x48] sm:$0xff]   ;;  %v1490_v29 = vld [vmem:[#allocation7 + $0x50] sm:$0xff]   ;;  %vm894_vm4 = vcmask 1040384   ;;  %vm1127_vm5 = vcmask 1041408  }
  0x61   :  { %1295 = vmatpush3.bf16.msra.mxu0 %v1482_v3  ;;  %1315 = vmatpush3.bf16.msra.mxu1 %v1483_v4  ;;  %106 = vst.msk [vmem:[#allocation2 + $0x1] sm:$0xff] %vm105_vm2, %v103_v11  ;;  %107 = vst.msk [vmem:[#allocation2 + $0x9] sm:$0xff] %vm105_vm2, %v104_v12  ;;  %v1833_v14 = vld [vmem:[#allocation4 + $0x18] sm:$0xff]  ;;  %v1492_v45 = vld [vmem:[#allocation9 + $0x40] sm:$0xff]  }
  0x62   :  { %1296 = vmatprep.subr.bf16.mxu0 %v1681_v0  ;;  %1316 = vmatprep.subr.bf16.mxu1 %v1681_v0  ;;  %v114_v16 = vmax.f32 %v1833_v14, 0.0  ;;  %115 = vst.msk [vmem:[#allocation2 + $0x13] sm:$0xff] %vm105_vm2, %v113_v15  ;;  %v1491_v33 = vld [vmem:[#allocation7 + $0x58] sm:$0xff]   ;;  %v1494_v46 = vld [vmem:[#allocation9 + $0x48] sm:$0xff]   ;;  %v1496_v47 = vld [vmem:[#allocation9 + $0x50] sm:$0xff]  }
  0x63   :  { %v1493_v48 = vld [vmem:[#allocation9] sm:$0xff]   ;;  %v1498_v49 = vld [vmem:[#allocation9 + $0x58] sm:$0xff]   ;;  %v1495_v50 = vld [vmem:[#allocation9 + $0x8] sm:$0xff]  }
  0x64   :  { %116 = vst.msk [vmem:[#allocation2 + $0x1b] sm:$0xff] %vm105_vm2, %v114_v16  ;;  %v1500_v51 = vld [vmem:[#allocation9 + $0x60] sm:$0xff]   ;;  %v1497_v52 = vld [vmem:[#allocation9 + $0x10] sm:$0xff]   ;;  %v1502_v53 = vld [vmem:[#allocation9 + $0x68] sm:$0xff]  }
  0x65   :  { %1297 = vmatpush3.bf16.msra.mxu0 %v1484_v5  ;;  %1317 = vmatpush3.bf16.msra.mxu1 %v1485_v6  ;;  %v1499_v54 = vld [vmem:[#allocation9 + $0x18] sm:$0xff]   ;;  %v1504_v55 = vld [vmem:[#allocation9 + $0x70] sm:$0xff]   ;;  %v1501_v56 = vld [vmem:[#allocation9 + $0x20] sm:$0xff]  }
  0x66   :  { %1298 = vmatprep.subr.bf16.mxu0 %v1681_v0  ;;  %1318 = vmatprep.subr.bf16.mxu1 %v1681_v0  ;;  %v1506_v57 = vld [vmem:[#allocation9 + $0x78] sm:$0xff]   ;;  %v1503_v58 = vld [vmem:[#allocation9 + $0x28] sm:$0xff]   ;;  %v1505_v59 = vld [vmem:[#allocation9 + $0x30] sm:$0xff]  }
  0x67   :  { %v1507_v60 = vld [vmem:[#allocation9 + $0x38] sm:$0xff]  }
  0x68   :  { %v134_v18 = vld [vmem:[#allocation2 + $0x1] sm:$0xff]  ;;  %v135_v19 = vld [vmem:[#allocation2 + $0x9] sm:$0xff] }
  0x69   :  { %1299 = vmatpush3.bf16.msra.mxu0 %v1486_v9  ;;  %1319 = vmatpush3.bf16.msra.mxu1 %v1487_v10  ;;  %v118_v20 = vld [vmem:[#allocation2] sm:$0xff]  ;;  %v139_v21 = vpack.c.bf16 %v135_v19, %v134_v18  ;;  %v119_v22 = vld [vmem:[#allocation2 + $0x8] sm:$0xff]  ;;  %v136_v25 = vld [vmem:[#allocation2 + $0x11] sm:$0xff] }
  0x6a   :  { %1332 = vmatprep.subr.bf16.mxu0 %v1681_v0  ;;  %1352 = vmatprep.subr.bf16.mxu1 %v1681_v0  ;;  %v123_v23 = vpack.c.bf16 %v119_v22, %v118_v20  ;;  %v120_v27 = vld [vmem:[#allocation2 + $0x10] sm:$0xff]  ;;  %v329_v37 = vld [vmem:[#allocation2 + $0x2] sm:$0xff] }
  0x6b   :  { %v137_v26 = vld [vmem:[#allocation2 + $0x19] sm:$0xff]  ;;  %v138_v32 = vld [vmem:[#allocation2 + $0x21] sm:$0x3]  ;;  %v330_v38 = vld [vmem:[#allocation2 + $0xa] sm:$0xff] }
  0x6c   :  { %1301 = vmatmul.mubr.msk.bf16.vlgmr.msra.gmra.mrb[0].mxu0 %vm105_vm2, %v139_v21  ;;  %1321 = vmatmul.mubr.msk.bf16.vlgmr.msra.gmra.mrb[0].mxu1 %vm105_vm2, %v123_v23  ;;  %v121_v28 = vld [vmem:[#allocation2 + $0x18] sm:$0xff]  ;;  %v140_v30 = vpack.c.bf16 %v137_v26, %v136_v25  ;;  %v122_v34 = vld [vmem:[#allocation2 + $0x20] sm:$0x3]  ;;  %v141_v35 = vpack.c.bf16 %v138_v32, %v138_v32  ;;  %v334_v39 = vpack.c.bf16 %v330_v38, %v329_v37  ;;  %v333_v43 = vld [vmem:[#allocation2 + $0x22] sm:$0x3] }
  0x6d   :  { %1333 = vmatpush3.bf16.msra.mxu0 %v1488_v17  ;;  %1304 = vmatprep.mubr.msk.bf16.mxu0 %vm1682_vm1, %v1681_v0  ;;  %v124_v31 = vpack.c.bf16 %v121_v28, %v120_v27  ;;  %v125_v36 = vpack.c.bf16 %v122_v34, %v122_v34  ;;  %v331_v40 = vld [vmem:[#allocation2 + $0x12] sm:$0xff]  ;;  %v332_v41 = vld [vmem:[#allocation2 + $0x1a] sm:$0xff]  ;;  %v336_v44 = vpack.c.bf16 %v333_v43, %v333_v43 }
  0x6e   :  { %1334 = vmatprep.subr.bf16.mxu0 %v1681_v0  ;;  %1324 = vmatprep.mubr.msk.bf16.mxu1 %vm1682_vm1, %v1681_v0  ;;  %v335_v42 = vpack.c.bf16 %v332_v41, %v331_v40  ;;  %v1181_v32 = vld [vmem:[%s1959_s2] ss:$0 sm:$0xff]  ;;  %v1508_v43 = vld [vmem:[#allocation9 + $0x80] sm:$0xff]  }
  0x6f   :  { %1353 = vmatpush3.bf16.msra.mxu1 %v1492_v45 }
  0x70   :  { %1354 = vmatprep.subr.bf16.mxu1 %v1681_v0 }
  0x71   :  { %1335 = vmatpush3.bf16.msra.mxu0 %v1489_v24 }
  0x72   :  { %1336 = vmatprep.subr.bf16.mxu0 %v1681_v0 }
  0x73   :  { %1355 = vmatpush3.bf16.msra.mxu1 %v1494_v46 }
  0x74   :  { %1305 = vmatmul.mubr.msk.bf16.gmra.mrb[4].mxu0 %vm105_vm2, %v140_v30  ;;  %1325 = vmatmul.mubr.msk.bf16.gmra.mrb[4].mxu1 %vm105_vm2, %v124_v31 }
  0x75   :  { %1337 = vmatpush3.bf16.msra.mxu0 %v1490_v29  ;;  %1308 = vmatprep.mubr.msk.bf16.mxu0 %vm1682_vm1, %v1681_v0 }
  0x76   :  { %1328 = vmatprep.mubr.msk.bf16.mxu1 %vm1682_vm1, %v1681_v0  ;;  %1338 = vmatprep.subr.bf16.mxu0 %v1681_v0 }
  0x77   :  { %1356 = vmatprep.subr.bf16.mxu1 %v1681_v0 }
  0x78   :  { %1357 = vmatpush3.bf16.msra.mxu1 %v1496_v47 }
  0x79   :  { %1339 = vmatpush3.bf16.msra.mxu0 %v1491_v33  ;;  %1358 = vmatprep.subr.bf16.mxu1 %v1681_v0 }
  0x7a   :  { %1380 = vmatprep.subr.bf16.mxu0 %v1681_v0 }
  0x7c   :  { %1309 = vmatmul.mubr.msk.bf16.gmra.mrb[8].mxu0 %vm105_vm2, %v141_v35  ;;  %1329 = vmatmul.mubr.msk.bf16.gmra.mrb[8].mxu1 %vm105_vm2, %v125_v36 }
  0x7d   :  { %1340 = vmatprep.mubr.msk.bf16.mxu0 %vm1682_vm1, %v1681_v0  ;;  %1368 = vmatprep.mubr.msk.bf16.mxu1 %vm1682_vm1, %v1681_v0 }
  0x7e   :  { %1359 = vmatpush3.bf16.msra.mxu1 %v1498_v49 }
  0x7f   :  { %1360 = vmatprep.subr.bf16.mxu1 %v1681_v0 }
  0x82   :  { %1361 = vmatpush3.bf16.msra.mxu1 %v1500_v51  ;;  %v1509_v51 = vld [vmem:[#allocation9 + $0x88] sm:$0xff]  }
  0x83   :  { %1362 = vmatprep.subr.bf16.mxu1 %v1681_v0 }
  0x84   :  { %1341 = vmatmul.mubr.msk.bf16.vlgmr.msra.gmra.mrb[12].mxu0 %vm105_vm2, %v334_v39 }
  0x85   :  { %1344 = vmatprep.mubr.msk.bf16.mxu0 %vm1682_vm1, %v1681_v0  ;;  %1381 = vmatpush3.bf16.msra.mxu0 %v1493_v48 }
  0x86   :  { %1382 = vmatprep.subr.bf16.mxu0 %v1681_v0  ;;  %1363 = vmatpush3.bf16.msra.mxu1 %v1502_v53 }
  0x87   :  { %1364 = vmatprep.subr.bf16.mxu1 %v1681_v0 }
  0x89   :  { %1383 = vmatpush3.bf16.msra.mxu0 %v1495_v50 }
  0x8a   :  { %1384 = vmatprep.subr.bf16.mxu0 %v1681_v0  ;;  %1365 = vmatpush3.bf16.msra.mxu1 %v1504_v55 }
  0x8b   :  { %1366 = vmatprep.subr.bf16.mxu1 %v1681_v0 }
  0x8c   :  { %1345 = vmatmul.mubr.msk.bf16.gmra.mrb[16].mxu0 %vm105_vm2, %v335_v42 }
  0x8d   :  { %1348 = vmatprep.mubr.msk.bf16.mxu0 %vm1682_vm1, %v1681_v0  ;;  %1385 = vmatpush3.bf16.msra.mxu0 %v1497_v52 }
  0x8e   :  { %1386 = vmatprep.subr.bf16.mxu0 %v1681_v0  ;;  %1367 = vmatpush3.bf16.msra.mxu1 %v1506_v57 }
  0x8f   :  { %1408 = vmatprep.subr.bf16.mxu1 %v1681_v0 }
  0x91   :  { %1387 = vmatpush3.bf16.msra.mxu0 %v1499_v54 }
  0x92   :  { %1388 = vmatprep.subr.bf16.mxu0 %v1681_v0 }
  0x94   :  { %1349 = vmatmul.mubr.msk.bf16.gmra.mrb[20].mxu0 %vm105_vm2, %v336_v44 }
  0x95   :  { %1396 = vmatprep.mubr.msk.bf16.mxu0 %vm1682_vm1, %v1681_v0  ;;  %1389 = vmatpush3.bf16.msra.mxu0 %v1501_v56 }
  0x96   :  { %1390 = vmatprep.subr.bf16.mxu0 %v1681_v0 }
  0x99   :  { %1391 = vmatpush3.bf16.msra.mxu0 %v1503_v58  ;;  %v1510_v58 = vld [vmem:[#allocation9 + $0x90] sm:$0xff]  }
  0x9a   :  { %1392 = vmatprep.subr.bf16.mxu0 %v1681_v0 }
  0x9d   :  { %1393 = vmatpush3.bf16.msra.mxu0 %v1505_v59 }
  0x9e   :  { %1394 = vmatprep.subr.bf16.mxu0 %v1681_v0 }
  0xa1   :  { %1395 = vmatpush3.bf16.msra.mxu0 %v1507_v60 }
  0xa2   :  { %1436 = vmatprep.subr.bf16.mxu0 %v1681_v0 }
 0x13f   :  { %v218_v61 = vpop.f32.mrb[0].mxu0  ;;  %v307_v62 = vpop.f32.mrb[0].mxu1 }
 0x140   :  { %v1302_v63 = vpop.f32.mrb[1].mxu0  ;;  %v308_v1 = vadd.f32 %v307_v62, %v218_v61  ;;  %v1322_v2 = vpop.f32.mrb[1].mxu1 }
 0x141   :  { %v221_v3 = vpop.f32.mrb[2].mxu0  ;;  %v310_v4 = vpop.f32.mrb[2].mxu1  ;;  %v1511_v2 = vld [vmem:[#allocation9 + $0x98] sm:$0xff]  }
 0x142   :  { %v1303_v5 = vpop.f32.mrb[3].mxu0  ;;  %v311_v6 = vadd.f32 %v310_v4, %v221_v3  ;;  %v1323_v9 = vpop.f32.mrb[3].mxu1 }
 0x147   :  { %v226_v10 = vpop.f32.mrb[4].mxu0  ;;  %v315_v11 = vpop.f32.mrb[4].mxu1 }
 0x148   :  { %v1306_v12 = vpop.f32.mrb[5].mxu0  ;;  %v316_v15 = vadd.f32 %v315_v11, %v226_v10  ;;  %v1326_v16 = vpop.f32.mrb[5].mxu1  ;;  %v1512_v10 = vld [vmem:[#allocation9 + $0xa0] sm:$0xff]  }
 0x149   :  { %v229_v17 = vpop.f32.mrb[6].mxu0  ;;  %v318_v18 = vpop.f32.mrb[6].mxu1  ;;  %v1513_v12 = vld [vmem:[#allocation9 + $0xa8] sm:$0xff]  }
 0x14a   :  { %v1307_v19 = vpop.f32.mrb[7].mxu0  ;;  %v319_v20 = vadd.f32 %v318_v18, %v229_v17  ;;  %v1327_v21 = vpop.f32.mrb[7].mxu1  ;;  %v1514_v18 = vld [vmem:[#allocation9 + $0xb0] sm:$0xff]  }
 0x14f   :  { %v234_v22 = vpop.f32.mrb[8].mxu0  ;;  %v323_v24 = vpop.f32.mrb[8].mxu1 }
 0x150   :  { %v1310_v23 = vpop.f32.mrb[9].mxu0  ;;  %v324_v25 = vadd.f32 %v323_v24, %v234_v22  ;;  %v1330_v27 = vpop.f32.mrb[9].mxu1 }
 0x151   :  { %v237_v26 = vpop.f32.mrb[10].mxu0  ;;  %v326_v29 = vpop.f32.mrb[10].mxu1 }
 0x152   :  { %v1311_v28 = vpop.f32.mrb[11].mxu0  ;;  %v1331_v30 = vpop.f32.mrb[11].mxu1  ;;  %v1516_v29 = vld [vmem:[#allocation10] sm:$0xff]  }
 0x153   :  { %v1517_v30 = vld [vmem:[#allocation10 + $0x8] sm:$0xff]  }
 0x157   :  { %v413_v31 = vpop.f32.mrb[12].mxu0 }
 0x158   :  { %v435_v33 = vadd.f32 %v413_v31, %v308_v1  ;;  %v1342_v34 = vpop.f32.mrb[13].mxu0  ;;  %v1518_v31 = vld [vmem:[#allocation10 + $0x10] sm:$0xff]  }
 0x159   :  { %v416_v35 = vpop.f32.mrb[14].mxu0  ;;  %v1521_v34 = vld [vmem:[#allocation10 + $0x28] sm:$0xff]  }
 0x15a   :  { %v448_v36 = vadd.f32 %v1181_v32, %v435_v33  ;;  %v436_v37 = vadd.f32 %v416_v35, %v311_v6  ;;  %v1343_v38 = vpop.f32.mrb[15].mxu0  ;;  %v1520_v33 = vld [vmem:[#allocation10 + $0x20] sm:$0xff]   ;;  %v1522_v35 = vld [vmem:[#allocation10 + $0x30] sm:$0xff]  }
 0x15b   :  { %v1525_v38 = vld [vmem:[#allocation12 + $0x8] sm:$0xff]  }
 0x15c   :  { %v450_v39 = vmax.f32 %v448_v36, 0.0  ;;  %v449_v40 = vadd.f32 %v1181_v32, %v436_v37  ;;  %v1523_v36 = vld [vmem:[#allocation10 + $0x38] sm:$0xff]   ;;  %v1524_v37 = vld [vmem:[#allocation12] sm:$0xff]  }
 0x15e   :  { %452 = vst [vmem:[#allocation3 + $0x1] sm:$0xff] %v450_v39  ;;  %v451_v41 = vmax.f32 %v449_v40, 0.0  ;;  %v1012_v40 = vpack.c.bf16 %v1824_v8, %v1822_v7 }
 0x15f   :  { %v421_v42 = vpop.f32.mrb[16].mxu0 }
 0x160   :  { %453 = vst [vmem:[#allocation3 + $0x9] sm:$0xff] %v451_v41  ;;  %v437_v44 = vadd.f32 %v421_v42, %v316_v15  ;;  %v1346_v45 = vpop.f32.mrb[17].mxu0  ;;  %v495_v46 = vpack.c.bf16 %v451_v41, %v450_v39  ;;  %v1526_v39 = vld [vmem:[#allocation12 + $0x10] sm:$0xff]   ;;  %v1527_v41 = vld [vmem:[#allocation12 + $0x18] sm:$0xff]   ;;  %v1013_v42 = vpack.c.bf16 %v1833_v14, %v1828_v13 }
 0x161   :  { %v424_v47 = vpop.f32.mrb[18].mxu0 }
 0x162   :  { %v456_v48 = vadd.f32 %v1181_v32, %v437_v44  ;;  %v438_v49 = vadd.f32 %v424_v47, %v319_v20  ;;  %v1347_v50 = vpop.f32.mrb[19].mxu0  ;;  %1369 = vmatmul.mubr.bf16.vlgmr.msra.gmra.mrb[12].mxu1 %v495_v46  ;;  %v1515_v20 = vld [vmem:[#allocation9 + $0xb8] sm:$0xff]  }
 0x163   :  { %1409 = vmatpush3.bf16.msra.mxu1 %v1508_v43  ;;  %1372 = vmatprep.mubr.msk.bf16.mxu1 %vm1682_vm1, %v1681_v0 }
 0x164   :  { %v459_v52 = vmax.f32 %v456_v48, 0.0  ;;  %v457_v53 = vadd.f32 %v1181_v32, %v438_v49  ;;  %1410 = vmatprep.subr.bf16.mxu1 %v1681_v0 }
 0x165   :  { %v466_v56 = vld [vmem:[#allocation3] sm:$0xff] }
 0x166   :  { %462 = vst [vmem:[#allocation3 + $0x11] sm:$0xfc] %v459_v52  ;;  %v460_v54 = vmax.f32 %v457_v53, 0.0 }
 0x167   :  { %v429_v55 = vpop.f32.mrb[20].mxu0  ;;  %v467_v57 = vld [vmem:[#allocation3 + $0x8] sm:$0xff]  ;;  %1411 = vmatpush3.bf16.msra.mxu1 %v1509_v51 }
 0x168   :  { %463 = vst [vmem:[#allocation3 + $0x19] sm:$0xff] %v460_v54  ;;  %v439_v59 = vadd.f32 %v429_v55, %v324_v25  ;;  %v471_v60 = vpack.c.bf16 %v467_v57, %v466_v56  ;;  %v1350_v61 = vpop.f32.mrb[21].mxu0  ;;  %1412 = vmatprep.subr.bf16.mxu1 %v1681_v0  ;;  %v723_v21 = vld [vmem:[#allocation3 + $0x2] sm:$0xff]  ;;  %v724_v22 = vld [vmem:[#allocation3 + $0xa] sm:$0xff] }
 0x169   :  { %v432_v62 = vpop.f32.mrb[22].mxu0  ;;  %v728_v23 = vpack.c.bf16 %v724_v22, %v723_v21 }
 0x16a   :  { %v458_v63 = vadd.f32 %v1181_v32, %v439_v59  ;;  %1397 = vmatmul.mubr.bf16.vlgmr.msra.gmra.mrb[24].mxu0 %v471_v60  ;;  %v1351_v1 = vpop.f32.mrb[23].mxu0  ;;  %v1519_v32 = vld [vmem:[#allocation10 + $0x18] sm:$0xff]  }
 0x16b   :  { %1400 = vmatprep.mubr.msk.bf16.mxu0 %vm1682_vm1, %v1681_v0  ;;  %1413 = vmatpush3.bf16.msra.mxu1 %v1510_v58 }
 0x16c   :  { %v461_v3 = vmax.f32 %v458_v63, 0.0  ;;  %1414 = vmatprep.subr.bf16.mxu1 %v1681_v0  ;;  %1437 = vmatpush3.bf16.msra.mxu0 %v1516_v29 }
 0x16d   :  { %v492_v4 = vld [vmem:[#allocation3 + $0x11] sm:$0xff]  ;;  %1438 = vmatprep.subr.bf16.mxu0 %v1681_v0 }
 0x16e   :  { %464 = vst [vmem:[#allocation3 + $0x21] sm:$0x3] %v461_v3  ;;  %v496_v5 = vpack.c.bf16 %v460_v54, %v492_v4  ;;  %v468_v6 = vld [vmem:[#allocation3 + $0x10] sm:$0xff] }
 0x16f   :  { %v469_v9 = vld [vmem:[#allocation3 + $0x18] sm:$0xff]  ;;  %1415 = vmatpush3.bf16.msra.mxu1 %v1511_v2 }
 0x170   :  { %1373 = vmatmul.mubr.bf16.gmra.mrb[16].mxu1 %v496_v5  ;;  %v472_v11 = vpack.c.bf16 %v469_v9, %v468_v6  ;;  %1416 = vmatprep.subr.bf16.mxu1 %v1681_v0  ;;  %v725_v25 = vld [vmem:[#allocation3 + $0x12] sm:$0xff] }
 0x171   :  { %1376 = vmatprep.mubr.msk.bf16.mxu1 %vm1682_vm1, %v1681_v0  ;;  %1439 = vmatpush3.bf16.msra.mxu0 %v1517_v30 }
 0x172   :  { %1401 = vmatmul.mubr.bf16.gmra.mrb[28].mxu0 %v472_v11  ;;  %1440 = vmatprep.subr.bf16.mxu0 %v1681_v0 }
 0x173   :  { %1404 = vmatprep.mubr.msk.bf16.mxu0 %vm1682_vm1, %v1681_v0  ;;  %1417 = vmatpush3.bf16.msra.mxu1 %v1512_v10 }
 0x174   :  { %1418 = vmatprep.subr.bf16.mxu1 %v1681_v0 }
 0x175   :  { %v494_v15 = vld [vmem:[#allocation3 + $0x21] sm:$0x3]  ;;  %1441 = vmatpush3.bf16.msra.mxu0 %v1518_v31 }
 0x176   :  { %v470_v16 = vld [vmem:[#allocation3 + $0x20] sm:$0x3]  ;;  %v497_v17 = vpack.c.bf16 %v494_v15, %v494_v15  ;;  %v727_v27 = vld [vmem:[#allocation3 + $0x22] sm:$0x3]  ;;  %1442 = vmatprep.subr.bf16.mxu0 %v1681_v0 }
 0x177   :  { %1419 = vmatpush3.bf16.msra.mxu1 %v1513_v12  ;;  %v473_v19 = vpack.c.bf16 %v470_v16, %v470_v16  ;;  %v726_v24 = vld [vmem:[#allocation3 + $0x1a] sm:$0xff]  ;;  %v730_v28 = vpack.c.bf16 %v727_v27, %v727_v27  ;;  %v1206_v12 = vld [vmem:[%s1961_s4] ss:$0 sm:$0xff] }
 0x178   :  { %1377 = vmatmul.mubr.bf16.gmra.mrb[20].mxu1 %v497_v17  ;;  %1420 = vmatprep.subr.bf16.mxu1 %v1681_v0  ;;  %v729_v26 = vpack.c.bf16 %v726_v24, %v725_v25 }
 0x179   :  { %1424 = vmatprep.mubr.msk.bf16.mxu1 %vm1682_vm1, %v1681_v0  ;;  %1443 = vmatpush3.bf16.msra.mxu0 %v1519_v32 }
 0x17a   :  { %1405 = vmatmul.mubr.bf16.gmra.mrb[32].mxu0 %v473_v19  ;;  %1444 = vmatprep.subr.bf16.mxu0 %v1681_v0 }
 0x17b   :  { %1421 = vmatpush3.bf16.msra.mxu1 %v1514_v18  ;;  %1452 = vmatprep.mubr.msk.bf16.mxu0 %vm1682_vm1, %v1681_v0 }
 0x17c   :  { %1422 = vmatprep.subr.bf16.mxu1 %v1681_v0 }
 0x17d   :  { %1445 = vmatpush3.bf16.msra.mxu0 %v1520_v33 }
 0x17e   :  { %1446 = vmatprep.subr.bf16.mxu0 %v1681_v0 }
 0x17f   :  { %1423 = vmatpush3.bf16.msra.mxu1 %v1515_v20 }
 0x180   :  { %1456 = vmatprep.subr.bf16.mxu1 %v1524_v37 }
 0x181   :  { %1447 = vmatpush3.bf16.msra.mxu0 %v1521_v34 }
 0x182   :  { %1425 = vmatmul.mubr.bf16.vlgmr.msra.gmra.mrb[24].mxu1 %v728_v23  ;;  %1448 = vmatprep.subr.bf16.mxu0 %v1681_v0 }
 0x183   :  { %1428 = vmatprep.mubr.msk.bf16.mxu1 %vm1682_vm1, %v1681_v0  ;;  %1457 = vmatpush3.bf16.msra.mxu1 %v1524_v37 }
 0x184   :  { %1458 = vmatprep.subr.bf16.mxu1 %v1525_v38 }
 0x185   :  { %1449 = vmatpush3.bf16.msra.mxu0 %v1522_v35 }
 0x186   :  { %1450 = vmatprep.subr.bf16.mxu0 %v1681_v0 }
 0x187   :  { %1459 = vmatpush3.bf16.msra.mxu1 %v1525_v38 }
 0x188   :  { %1460 = vmatprep.subr.bf16.mxu1 %v1526_v39 }
 0x189   :  { %1451 = vmatpush3.bf16.msra.mxu0 %v1523_v36 }
 0x18a   :  { %1429 = vmatmul.mubr.bf16.gmra.mrb[28].mxu1 %v729_v26 }
 0x18b   :  { %1432 = vmatprep.mubr.msk.bf16.mxu1 %vm1682_vm1, %v1681_v0  ;;  %1461 = vmatpush3.bf16.msra.mxu1 %v1526_v39 }
 0x18c   :  { %1462 = vmatprep.subr.bf16.mxu1 %v1527_v41 }
 0x18f   :  { %1463 = vmatpush3.bf16.msra.mxu1 %v1527_v41 }
 0x192   :  { %1433 = vmatmul.mubr.bf16.gmra.mrb[32].mxu1 %v730_v28 }
 0x193   :  { %1464 = vmatprep.mubr.msk.bf16.mxu1 %vm105_vm2, %v1012_v40 }
 0x19a   :  { %1465 = vmatmul.mubr.msk.bf16.vlgmr.msra.gmra.mrb[36].mxu1 %vm105_vm2, %v1013_v42 }
 0x235   :  { %v597_v0 = vpop.f32.mrb[12].mxu1 }
 0x236   :  { %v1370_v43 = vpop.f32.mrb[13].mxu1 }
 0x237   :  { %v600_v44 = vpop.f32.mrb[14].mxu1 }
 0x238   :  { %v1371_v45 = vpop.f32.mrb[15].mxu1 }
 0x23d   :  { %v701_v46 = vpop.f32.mrb[24].mxu0 }
 0x23e   :  { %v702_v7 = vadd.f32 %v701_v46, %v597_v0  ;;  %v1398_v8 = vpop.f32.mrb[25].mxu0 }
 0x23f   :  { %v704_v47 = vpop.f32.mrb[26].mxu0 }
 0x240   :  { %v705_v48 = vadd.f32 %v704_v47, %v600_v44  ;;  %v1399_v49 = vpop.f32.mrb[27].mxu0 }
 0x243   :  { %v605_v50 = vpop.f32.mrb[16].mxu1 }
 0x244   :  { %v1374_v51 = vpop.f32.mrb[17].mxu1 }
 0x245   :  { %v709_v52 = vpop.f32.mrb[28].mxu0  ;;  %v608_v53 = vpop.f32.mrb[18].mxu1  ;;  %v1216_v51 = vld [vmem:[%s1964_s7] ss:$0 sm:$0xff]  ;;  %s1683_s7 = smov [#allocation13]  }
 0x246   :  { %v710_v54 = vadd.f32 %v709_v52, %v605_v50  ;;  %v1402_v55 = vpop.f32.mrb[29].mxu0  ;;  %v1375_v13 = vpop.f32.mrb[19].mxu1  ;;  %s1146_s27 = sshll.u32 %s1683_s7, 4  ;;  %s1147_s27 = int_to_ptr.vmem [resolvable:$true] %s1146_s27 }
 0x247   :  { %v712_v14 = vpop.f32.mrb[30].mxu0  ;;  %s1642_s29 = scalar_lea.vmem %s1147_s27, 512  ;;  %p1647_p13 = scmp.lt.s32.totalorder %s1147_s27, %s1147_s27 }
 0x248   :  { %v713_v56 = vadd.f32 %v712_v14, %v608_v53  ;;  %v1403_v57 = vpop.f32.mrb[31].mxu0  ;;  %p1643_p12 = scmp.ne.s32.totalorder %s1147_s27, %s1642_s29  ;;  %p1648_p0 = scmp.lt.s32.totalorder %s1642_s29, %s1642_s29 }
 0x24a   :  { %p1649_p1 = por %p1648_p0, %p1647_p13 }
 0x24b   :  { %v613_v58 = vpop.f32.mrb[20].mxu1 }
 0x24c   :  { %v1378_v59 = vpop.f32.mrb[21].mxu1  ;;  %p1650_p2 = pnand %p1649_p1, %p1643_p12 }
 0x24d   :  { %v717_v60 = vpop.f32.mrb[32].mxu0  ;;  %v616_v61 = vpop.f32.mrb[22].mxu1 }
 0x24e   :  { %v718_v62 = vadd.f32 %v717_v60, %v613_v58  ;;  %v1406_v63 = vpop.f32.mrb[33].mxu0  ;;  %v1379_v1 = vpop.f32.mrb[23].mxu1 }
 0x24f   :  { %v720_v2 = vpop.f32.mrb[34].mxu0 }
 0x250   :  { %v1407_v3 = vpop.f32.mrb[35].mxu0  ;;  %v1108_v2 = vlaneseq }
 0x252   :  { %v1109_v3 = vshrl.u32 %v1108_v2, 7 }
 0x255   :  { %v830_v4 = vpop.f32.mrb[24].mxu1 }
 0x256   :  { %v852_v5 = vadd.f32 %v830_v4, %v702_v7  ;;  %v1426_v6 = vpop.f32.mrb[25].mxu1  ;;  %v1120_v4 = vsub.s32 1, %v1109_v3 }
 0x257   :  { %v833_v9 = vpop.f32.mrb[26].mxu1 }
 0x258   :  { %v853_v10 = vadd.f32 %v833_v9, %v705_v48  ;;  %v1427_v11 = vpop.f32.mrb[27].mxu1  ;;  %v1933_v19 = vadd.f32 %v1206_v12, %v852_v5  ;;  %v1110_v5 = vsub.s32 0, %v1109_v3 }
 0x25a   :  { %v1931_v15 = vadd.f32 %v1206_v12, %v853_v10 }
 0x25c   :  { %v869_v23 = vadd.f32 %v1931_v15, %v1933_v19 }
 0x25d   :  { %v838_v16 = vpop.f32.mrb[28].mxu1 }
 0x25e   :  { %v854_v17 = vadd.f32 %v838_v16, %v710_v54  ;;  %v1430_v18 = vpop.f32.mrb[29].mxu1  ;;  %v870_v25 = vrot.slane %v869_v23, 4 }
 0x25f   :  { %v841_v20 = vpop.f32.mrb[30].mxu1 }
 0x260   :  { %v855_v21 = vadd.f32 %v841_v20, %v713_v56  ;;  %v1431_v22 = vpop.f32.mrb[31].mxu1  ;;  %v866_v27 = vadd.f32 %v1206_v12, %v854_v17  ;;  %v871_v34 = vadd.f32 %v870_v25, %v869_v23 }
 0x262   :  { %v867_v24 = vadd.f32 %v1206_v12, %v855_v21  ;;  %v880_v35 = vrot.slane %v866_v27, 2  ;;  %v872_v39 = vrot.slane %v871_v34, 2 }
 0x264   :  { %v881_v31 = vrot.slane %v867_v24, 2  ;;  %v873_v42 = vadd.f32 %v872_v39, %v871_v34 }
 0x265   :  { %v846_v26 = vpop.f32.mrb[32].mxu1 }
 0x266   :  { %v856_v28 = vadd.f32 %v846_v26, %v718_v62  ;;  %v1434_v29 = vpop.f32.mrb[33].mxu1  ;;  %v882_v37 = vsel %vm879_vm3, %v880_v35, %v881_v31  ;;  %v874_v44 = vrot.slane %v873_v42, 1 }
 0x267   :  { %v849_v30 = vpop.f32.mrb[34].mxu1 }
 0x268   :  { %v868_v32 = vadd.f32 %v1206_v12, %v856_v28  ;;  %v1435_v33 = vpop.f32.mrb[35].mxu1  ;;  %v875_v7 = vadd.f32 %v874_v44, %v873_v42 }
 0x26a   :  { %v883_v36 = vrot.slane %v868_v32, 2 }
 0x26c   :  { %v884_v38 = vsel %vm879_vm3, %v881_v31, %v883_v36 }
 0x26d   :  { %v887_v40 = vadd.f32 %v884_v38, %v882_v37  ;;  %v1466_v50 = vpop.f32.mrb[36].mxu1 }
 0x26e   :  { %v1093_v52 = vpop.f32.mrb[37].mxu1  ;;  %v1102_v53 = vadd.f32 %v1466_v50, %v1216_v51 }
 0x26f   :  { %v888_v41 = vrot.slane %v887_v40, 4  ;;  %v1467_v54 = vpop.f32.mrb[38].mxu1  ;;  %v1094_v11 = vadd.f32 %v1216_v51, %v1093_v52 }
 0x270   :  { %v1096_v55 = vpop.f32.mrb[39].mxu1  ;;  %v1105_v13 = vadd.f32 %v1467_v54, %v1216_v51  ;;  %v1128_v14 = vrot.slane %v1102_v53, 6 }
 0x271   :  { %v889_v0 = vadd.f32 %v888_v41, %v887_v40  ;;  %v1097_v20 = vadd.f32 %v1216_v51, %v1096_v55 }
 0x272   :  { %v1129_v56 = vrot.slane %v1105_v13, 6 }
 0x273   :  { %v890_v43 = vrot.slane %v889_v0, 2 }
 0x274   :  { %v1130_v57 = vsel %vm1127_vm5, %v1128_v14, %v1129_v56 }
 0x275   :  { %v891_v45 = vadd.f32 %v890_v43, %v889_v0 }
 0x277   :  { %v892_v46 = vrot.slane %v891_v45, 1 }
 0x279   :  { %v893_v8 = vadd.f32 %v892_v46, %v891_v45 }
 0x27b   :  { %v895_v47 = vsel %vm894_vm4, %v875_v7, %v893_v8 }
 0x27c   :  { %v896_v48 = vmul.f32 0.00390625, %v895_v47 }
 0x27e   :  { %v897_v49 = vpack.c.bf16 %v896_v48, %v896_v48 }
 0x280   :  { %1453 = vmatmul.mubr.bf16.vlgmr.msra.gmra.mrb[36].mxu0 %v897_v49 }
 0x353   :  { %v996_v58 = vpop.f32.mrb[36].mxu0 }
 0x354   :  { %v1215_v59 = vmul.f32 -1.442695, %v996_v58  ;;  %v1454_v60 = vpop.f32.mrb[37].mxu0 }
 0x355   :  { %v999_v61 = vpop.f32.mrb[38].mxu0 }
 0x356   :  { %1528 = vpow2.f32 %v1215_v59  ;;  %v1455_v62 = vpop.f32.mrb[39].mxu0 }
 0x360   :  { %v1529_v63 = vpop.eup %1528 }
 0x361   :  { %v1005_v1 = vadd.f32 1.0, %v1529_v63 }
 0x363   :  { %1530 = vrcp.f32 %v1005_v1 }
 0x36d   :  { %v1531_v6 = vpop.eup %1530 }
 0x36e   :  { %v1121_v9 = vrot.slane %v1531_v6, %v1120_v4  ;;  %v1111_v10 = vrot.slane %v1531_v6, %v1110_v5 }
 0x370   :  { %v1122_v12 = vmul.f32 %v1121_v9, %v866_v27  ;;  %v1112_v16 = vmul.f32 %v1111_v10, %v1933_v19  ;;  %v1123_v17 = vmul.f32 %v1121_v9, %v867_v24  ;;  %v1124_v18 = vmul.f32 %v1121_v9, %v868_v32 }
 0x371   :  { %v1113_v21 = vmul.f32 %v1111_v10, %v1931_v15 }
 0x372   :  { %v1134_v22 = vadd.f32 %v1128_v14, %v1122_v12  ;;  %v1114_v23 = vadd.f32 %v1112_v16, %v1094_v11  ;;  %v1135_v25 = vadd.f32 %v1130_v57, %v1123_v17  ;;  %v1136_v26 = vadd.f32 %v1129_v56, %v1124_v18 }
 0x373   :  { %v1115_v28 = vadd.f32 %v1113_v21, %v1097_v20 }
 0x374   :  { %1138 = vst [vmem:[#allocation13 + $0xe] sm:$0xfc] %v1134_v22  ;;  %1116 = vst [vmem:[#allocation13] sm:$0xff] %v1114_v23 }
 0x375   :  { %1139 = vst [vmem:[#allocation13 + $0x16] sm:$0xff] %v1135_v25  ;;  %1140 = vst [vmem:[#allocation13 + $0x1e] sm:$0x3] %v1136_v26 }
 0x376   :  { %1117 = vst [vmem:[#allocation13 + $0x8] sm:$0xff] %v1115_v28 }
 0x377   :  { %1653 = shalt.err (!%p1650_p2)
}
 0x378   :  { %s1654_s28 = scalar_lea.hbm %s1965_s8, 512 }
 0x379   :  { %p1655_p3 = scmp.ne.s32.totalorder %s1965_s8, %s1654_s28  ;;  %p1658_p4 = scmp.lt.u32.totalorder %s1654_s28, %s1965_s8 }
 0x37b   :  { %p1660_p5 = pnand %p1658_p4, %p1655_p3 }
 0x37d   :  { %1663 = shalt.err (!%p1660_p5)
}
 0x37e   :  { %1152 = dma.vmem_to_hbm [thread:$0]  %s1147_s27, 512, %s1965_s8, [#allocation6], %s1677_s5, %s1677_s5, %s1678_s20  }
 0x37f   :  { %1670 = dma.done.wait [#allocation6], 512  }
 0x380   :  { %1671 = vsyncadd [#allocation6], 4294966784 }
 0x381   :  { %1156 = vsyncpa [#allocation5], 1 }
 0x382   :  { %1157 = vsyncpa [#allocation8], 1 }
 0x383   :  { %1158 = vsyncpa [#allocation11], 1 }
 0x384   :  { %1159 = vsyncpa [#allocation6], 1 }

</bundles_post_ra>
